<compile_context>
chip_gen: v7x
topology: tpu7x:2x2x1
jax: 0.10.0
libtpu: 0.0.40
codegen_flags: <defaults>
</compile_context>

<pallas_src>
import jax
import jax.numpy as jnp
from jax import lax
from jax.experimental import pallas as pl
from jax.experimental.pallas import tpu as pltpu


# --------------------------------------------------------------------------
# Kernel 1: conv(3->13, 3x3, s2, p1) + maxpool(2x2, s2) + fused BN partials
# --------------------------------------------------------------------------
def feat_stats_kernel(pat_ref, w_ref, b_ref, feat_ref, stats_ref):
    # pat_ref  : (1, 27, T)  channel-major im2col patches, row = (kh*3+kw)*3+c
    # w_ref    : (13, 27)    folded conv weight
    # b_ref    : (13, 1)     conv bias
    # feat_ref : (1, 16, T)  concat([conv, pool], channel) -- lane-dense
    # stats_ref: (1, 16, 2)  per-channel [sum, sum_sq], accumulated over batch
    pat = pat_ref[0]                                              # (27, T)

    conv = jnp.dot(w_ref[...], pat,
                   preferred_element_type=jnp.float32) + b_ref[...]  # (13, T)

    # pool taps == conv taps with (kh,kw) in {1,2}x{1,2} -> rows 12:15, 15:18,
    # 21:24, 24:27 (never touches the zero padding).
    pool = jnp.maximum(jnp.maximum(pat[12:15, :], pat[15:18, :]),
                       jnp.maximum(pat[21:24, :], pat[24:27, :]))     # (3, T)

    # direct slice stores (no lane/sublane concat of the big tiles)
    feat_ref[0, 0:13, :] = conv
    feat_ref[0, 13:16, :] = pool

    # per-channel partial sums for training-mode BN batch stats
    c1 = jnp.sum(conv, axis=1, keepdims=True)                     # (13, 1)
    c2 = jnp.sum(conv * conv, axis=1, keepdims=True)              # (13, 1)
    p1 = jnp.sum(pool, axis=1, keepdims=True)                     # (3, 1)
    p2 = jnp.sum(pool * pool, axis=1, keepdims=True)              # (3, 1)
    part = jnp.concatenate([jnp.concatenate([c1, c2], axis=1),
                            jnp.concatenate([p1, p2], axis=1)], axis=0)  # (16,2)

    n = pl.program_id(1)   # batch axis (inner, "arbitrary") carries the accum

    @pl.when(n == 0)
    def _init():
        stats_ref[0] = part

    @pl.when(n != 0)
    def _acc():
        stats_ref[0] += part


# --------------------------------------------------------------------------
# Kernel 2: streamed normalize (precomputed scale/shift) + ReLU
# --------------------------------------------------------------------------
def bn_relu_kernel(f_ref, scale_ref, shift_ref, o_ref):
    # f_ref: (1, 16, T), scale/shift: (16, 1), o_ref: (1, 16, T)
    o_ref[0] = jnp.maximum(f_ref[0] * scale_ref[...] + shift_ref[...],
                           jnp.float32(0.0))


# --------------------------------------------------------------------------
# Wrapper
# --------------------------------------------------------------------------
def _pick_tile(hw, target=8192):
    """Largest spatial tile <= target that evenly divides hw (lane aligned)."""
    if hw <= target:
        return hw
    t = (target // 128) * 128
    while t >= 128:
        if hw % t == 0:
            return t
        t -= 128
    return hw  # fallback: single block


def initial_block(x_nchw, conv_w, conv_b, bn_gamma, bn_beta, *, tile_hw=8192):
    """x_nchw: (N, 3, H, W) f32; returns (N, 16, H//2, W//2) f32 (NCHW)."""
    N, C, H, W = x_nchw.shape
    assert C == 3 and H % 2 == 0 and W % 2 == 0
    Ho, Wo = H // 2, W // 2
    HW = Ho * Wo
    T = _pick_tile(HW, tile_hw)   # fits double-buffered in VMEM on v5e/v6e/v7x
    num_tiles = HW // T

    x = x_nchw.astype(jnp.float32)
    x_pad = jnp.pad(x, ((0, 0), (0, 0), (1, 1), (1, 1)))

    # ---- glue: channel-major im2col (N, 27, HW); HW is the lane axis ----
    taps = [x_pad[:, :, kh:kh + 2 * Ho:2, kw:kw + 2 * Wo:2]
            for kh in range(3) for kw in range(3)]        # 9 x (N, 3, Ho, Wo)
    patches = jnp.stack(taps, axis=1).reshape(N, 27, HW)  # row = (kh*3+kw)*3+c

    # conv weight (O=13, I=3, KH, KW) -> (13, 27), column = (kh*3+kw)*3 + c
    w_mat = jnp.transpose(conv_w, (0, 2, 3, 1)).reshape(13, 27).astype(jnp.float32)
    b_mat = conv_b.reshape(13, 1).astype(jnp.float32)

    # ---- kernel 1: conv + pool + concat + fused BN stats partials ----
    feat, stats = pl.pallas_call(
        feat_stats_kernel,
        out_shape=(jax.ShapeDtypeStruct((N, 16, HW), jnp.float32),
                   jax.ShapeDtypeStruct((num_tiles, 16, 2), jnp.float32)),
        grid=(num_tiles, N),   # t outer ("parallel"), n inner (stats accum)
        in_specs=[
            pl.BlockSpec((1, 27, T), lambda t, n: (n, 0, t)),
            pl.BlockSpec((13, 27), lambda t, n: (0, 0)),
            pl.BlockSpec((13, 1), lambda t, n: (0, 0)),
        ],
        out_specs=(
            pl.BlockSpec((1, 16, T), lambda t, n: (n, 0, t)),
            pl.BlockSpec((1, 16, 2), lambda t, n: (t, 0, 0)),
        ),
        compiler_params=pltpu.CompilerParams(
            dimension_semantics=("parallel", "arbitrary")),
        cost_estimate=pl.CostEstimate(
            flops=2 * 13 * 27 * HW * N + 8 * 16 * HW * N,
            transcendentals=0,
            bytes_accessed=4 * N * HW * (27 + 16)),
    )(patches, w_mat, b_mat)

    # ---- BN finalize (16 channels): plain JAX on the tiny partials ----
    tot = jnp.sum(stats, axis=0)                          # (16, 2)
    cnt = jnp.float32(N * HW)
    mean = tot[:, 0] / cnt
    var = tot[:, 1] / cnt - mean * mean                   # biased (train mode)
    inv = lax.rsqrt(var + jnp.float32(1e-3))
    scale = bn_gamma.astype(jnp.float32) * inv            # (16,)
    shift = bn_beta.astype(jnp.float32) - mean * scale    # (16,)
    scale = scale.reshape(16, 1)
    shift = shift.reshape(16, 1)

    # ---- kernel 2: streamed normalize + ReLU ----
    out_flat = pl.pallas_call(
        bn_relu_kernel,
        out_shape=jax.ShapeDtypeStruct((N, 16, HW), jnp.float32),
        grid=(N, num_tiles),
        in_specs=[
            pl.BlockSpec((1, 16, T), lambda n, t: (n, 0, t)),
            pl.BlockSpec((16, 1), lambda n, t: (0, 0)),
            pl.BlockSpec((16, 1), lambda n, t: (0, 0)),
        ],
        out_specs=pl.BlockSpec((1, 16, T), lambda n, t: (n, 0, t)),
        compiler_params=pltpu.CompilerParams(
            dimension_semantics=("parallel", "parallel")),
        cost_estimate=pl.CostEstimate(
            flops=3 * 16 * HW * N,
            transcendentals=0,
            bytes_accessed=2 * 4 * N * 16 * HW),
    )(feat, scale, shift)

    # (N, 16, HW) is already NCHW-flat: just reshape, no transpose.
    return out_flat.reshape(N, 16, Ho, Wo)


# --------------------------------------------------------------------------
# Pure-JAX reference (for correctness check)
# --------------------------------------------------------------------------
def initial_block_ref(x, w, b, gamma, beta):
    conv = lax.conv_general_dilated(
        x, w, window_strides=(2, 2), padding=((1, 1), (1, 1)),
        dimension_numbers=("NCHW", "OIHW", "NCHW")) + b[None, :, None, None]
    pool = lax.reduce_window(x, -jnp.inf, lax.max,
                             (1, 1, 2, 2), (1, 1, 2, 2), "VALID")
    cat = jnp.concatenate([conv, pool], axis=1)
    mean = cat.mean(axis=(0, 2, 3), keepdims=True)
    var = cat.var(axis=(0, 2, 3), keepdims=True)          # biased (train mode)
    y = (cat - mean) / jnp.sqrt(var + 1e-3)
    y = y * gamma[None, :, None, None] + beta[None, :, None, None]
    return jnp.maximum(y, 0.0)


if __name__ == "__main__":
    key = jax.random.PRNGKey(0)
    k_w, k_b, k_g, k_be, k_x = jax.random.split(key, 5)

    # Deterministic synthetic parameters (shapes from the module __init__).
    conv_w = jax.random.normal(k_w, (13, 3, 3, 3), jnp.float32) * 0.2
    conv_b = jax.random.normal(k_b, (13,), jnp.float32) * 0.1
    bn_gamma = 1.0 + 0.1 * jax.random.normal(k_g, (16,), jnp.float32)
    bn_beta = 0.1 * jax.random.normal(k_be, (16,), jnp.float32)

    # Input: NCHW, 3 channels (as required by Conv2d(3, 13, ...)).
    x = jax.random.normal(k_x, (2, 3, 16, 16), jnp.float32)

    out = jax.block_until_ready(
        initial_block(x, conv_w, conv_b, bn_gamma, bn_beta))

    ref = initial_block_ref(x, conv_w, conv_b, bn_gamma, bn_beta)
    assert out.shape == (2, 16, 8, 8)
    assert jnp.allclose(out, ref, atol=1e-4, rtol=1e-4), "mismatch vs reference"

    print("KERNEL_OK")
</pallas_src>

<mosaic_0001>
module attributes {stable_mosaic.version = 11 : i64} {
  func.func @feat_stats_kernel(%arg0: i32, %arg1: i32, %arg2: memref<1x27x64xf32, #tpu.memory_space<vmem>>, %arg3: memref<13x27xf32, #tpu.memory_space<vmem>>, %arg4: memref<13x1xf32, #tpu.memory_space<vmem>>, %arg5: memref<1x16x64xf32, #tpu.memory_space<vmem>>, %arg6: memref<1x16x2xf32, #tpu.memory_space<vmem>>) attributes {dimension_semantics = [#tpu.dimension_semantics<parallel>, #tpu.dimension_semantics<arbitrary>], iteration_bounds = array<i64: 1, 2>, scalar_prefetch = 0 : i64, scratch_operands = 0 : i64, tpu.core_type = #tpu.core_type<tc>, window_params = [{transform_indices = @transform_0, window_bounds = array<i64: 1, 27, 64>}, {pipeline_mode = #tpu.pipeline_mode<synchronous>, transform_indices = @transform_1, window_bounds = array<i64: 13, 27>}, {pipeline_mode = #tpu.pipeline_mode<synchronous>, transform_indices = @transform_2, window_bounds = array<i64: 13, 1>}, {transform_indices = @transform_3, window_bounds = array<i64: 1, 16, 64>}, {transform_indices = @transform_4, window_bounds = array<i64: 1, 16, 2>}]} {
    %c0 = arith.constant 0 : index
    %c0_0 = arith.constant 0 : index
    %c0_1 = arith.constant 0 : index
    %0 = vector.load %arg2[%c0, %c0_0, %c0_1] : memref<1x27x64xf32, #tpu.memory_space<vmem>>, vector<1x27x64xf32>
    %1 = vector.shape_cast %0 : vector<1x27x64xf32> to vector<27x64xf32>
    %c0_2 = arith.constant 0 : index
    %c0_3 = arith.constant 0 : index
    %2 = vector.load %arg3[%c0_2, %c0_3] : memref<13x27xf32, #tpu.memory_space<vmem>>, vector<13x27xf32>
    %cst = arith.constant dense<0.000000e+00> : vector<13x64xf32>
    %3 = tpu.matmul %2, %1, %cst {dimension_numbers = #tpu.dot_dimension_numbers<[1], [0], [0], [1], [0, 0, 1, 1], [], []>} : vector<13x27xf32>, vector<27x64xf32>, vector<13x64xf32> -> vector<13x64xf32>
    %c0_4 = arith.constant 0 : index
    %c0_5 = arith.constant 0 : index
    %4 = vector.load %arg4[%c0_4, %c0_5] : memref<13x1xf32, #tpu.memory_space<vmem>>, vector<13x1xf32>
    %5 = vector.broadcast %4 : vector<13x1xf32> to vector<13x64xf32>
    %6 = arith.addf %3, %5 : vector<13x64xf32>
    %7 = vector.extract_strided_slice %1 {offsets = [12, 0], sizes = [3, 64], strides = [1, 1]} : vector<27x64xf32> to vector<3x64xf32>
    %8 = vector.extract_strided_slice %1 {offsets = [15, 0], sizes = [3, 64], strides = [1, 1]} : vector<27x64xf32> to vector<3x64xf32>
    %9 = arith.maximumf %7, %8 : vector<3x64xf32>
    %10 = vector.extract_strided_slice %1 {offsets = [21, 0], sizes = [3, 64], strides = [1, 1]} : vector<27x64xf32> to vector<3x64xf32>
    %11 = vector.extract_strided_slice %1 {offsets = [24, 0], sizes = [3, 64], strides = [1, 1]} : vector<27x64xf32> to vector<3x64xf32>
    %12 = arith.maximumf %10, %11 : vector<3x64xf32>
    %13 = arith.maximumf %9, %12 : vector<3x64xf32>
    %c0_6 = arith.constant 0 : index
    %c0_7 = arith.constant 0 : index
    %c0_8 = arith.constant 0 : index
    %14 = vector.load %arg5[%c0_6, %c0_7, %c0_8] : memref<1x16x64xf32, #tpu.memory_space<vmem>>, vector<1x13x64xf32>
    %15 = vector.shape_cast %14 : vector<1x13x64xf32> to vector<13x64xf32>
    %16 = vector.shape_cast %6 : vector<13x64xf32> to vector<1x13x64xf32>
    tpu.vector_store %arg5[%c0_6, %c0_7, %c0_8], %16 {strides = array<i32>} : memref<1x16x64xf32, #tpu.memory_space<vmem>>, vector<1x13x64xf32>,
    %c0_9 = arith.constant 0 : index
    %c13 = arith.constant 13 : index
    %c0_10 = arith.constant 0 : index
    %17 = vector.load %arg5[%c0_9, %c13, %c0_10] : memref<1x16x64xf32, #tpu.memory_space<vmem>>, vector<1x3x64xf32>
    %18 = vector.shape_cast %17 : vector<1x3x64xf32> to vector<3x64xf32>
    %19 = vector.shape_cast %13 : vector<3x64xf32> to vector<1x3x64xf32>
    tpu.vector_store %arg5[%c0_9, %c13, %c0_10], %19 {strides = array<i32>} : memref<1x16x64xf32, #tpu.memory_space<vmem>>, vector<1x3x64xf32>,
    %cst_11 = arith.constant dense<0.000000e+00> : vector<13xf32>
    %20 = vector.multi_reduction <add>, %6, %cst_11 [1] : vector<13x64xf32> to vector<13xf32>
    %21 = vector.shape_cast %20 : vector<13xf32> to vector<13x1xf32>
    %22 = arith.mulf %6, %6 : vector<13x64xf32>
    %cst_12 = arith.constant dense<0.000000e+00> : vector<13xf32>
    %23 = vector.multi_reduction <add>, %22, %cst_12 [1] : vector<13x64xf32> to vector<13xf32>
    %24 = vector.shape_cast %23 : vector<13xf32> to vector<13x1xf32>
    %cst_13 = arith.constant dense<0.000000e+00> : vector<3xf32>
    %25 = vector.multi_reduction <add>, %13, %cst_13 [1] : vector<3x64xf32> to vector<3xf32>
    %26 = vector.shape_cast %25 : vector<3xf32> to vector<3x1xf32>
    %27 = arith.mulf %13, %13 : vector<3x64xf32>
    %cst_14 = arith.constant dense<0.000000e+00> : vector<3xf32>
    %28 = vector.multi_reduction <add>, %27, %cst_14 [1] : vector<3x64xf32> to vector<3xf32>
    %29 = vector.shape_cast %28 : vector<3xf32> to vector<3x1xf32>
    %30 = tpu.concatenate %21, %24 in 1 : vector<13x1xf32>, vector<13x1xf32> -> vector<13x2xf32>
    %31 = tpu.concatenate %26, %29 in 1 : vector<3x1xf32>, vector<3x1xf32> -> vector<3x2xf32>
    %32 = tpu.concatenate %30, %31 in 0 : vector<13x2xf32>, vector<3x2xf32> -> vector<16x2xf32>
    %c0_i32 = arith.constant 0 : i32
    %33 = arith.cmpi eq, %arg1, %c0_i32 : i32
    %34 = arith.extui %33 : i1 to i32
    %c0_i32_15 = arith.constant 0 : i32
    %35 = arith.cmpi ne, %34, %c0_i32_15 : i32
    scf.if %35 {
      %c0_18 = arith.constant 0 : index
      %c0_19 = arith.constant 0 : index
      %c0_20 = arith.constant 0 : index
      %39 = vector.load %arg6[%c0_18, %c0_19, %c0_20] : memref<1x16x2xf32, #tpu.memory_space<vmem>>, vector<1x16x2xf32>
      %40 = vector.shape_cast %39 : vector<1x16x2xf32> to vector<16x2xf32>
      %41 = vector.shape_cast %32 : vector<16x2xf32> to vector<1x16x2xf32>
      tpu.vector_store %arg6[%c0_18, %c0_19, %c0_20], %41 {strides = array<i32>} : memref<1x16x2xf32, #tpu.memory_space<vmem>>, vector<1x16x2xf32>,
    } else {
    }
    %c0_i32_16 = arith.constant 0 : i32
    %36 = arith.cmpi ne, %arg1, %c0_i32_16 : i32
    %37 = arith.extui %36 : i1 to i32
    %c0_i32_17 = arith.constant 0 : i32
    %38 = arith.cmpi ne, %37, %c0_i32_17 : i32
    scf.if %38 {
      %c0_18 = arith.constant 0 : index
      %c0_19 = arith.constant 0 : index
      %c0_20 = arith.constant 0 : index
      %39 = vector.load %arg6[%c0_18, %c0_19, %c0_20] : memref<1x16x2xf32, #tpu.memory_space<vmem>>, vector<1x16x2xf32>
      %40 = vector.shape_cast %39 : vector<1x16x2xf32> to vector<16x2xf32>
      %41 = arith.addf %40, %32 : vector<16x2xf32>
      %c0_21 = arith.constant 0 : index
      %c0_22 = arith.constant 0 : index
      %c0_23 = arith.constant 0 : index
      %42 = vector.load %arg6[%c0_21, %c0_22, %c0_23] : memref<1x16x2xf32, #tpu.memory_space<vmem>>, vector<1x16x2xf32>
      %43 = vector.shape_cast %42 : vector<1x16x2xf32> to vector<16x2xf32>
      %44 = vector.shape_cast %41 : vector<16x2xf32> to vector<1x16x2xf32>
      tpu.vector_store %arg6[%c0_21, %c0_22, %c0_23], %44 {strides = array<i32>} : memref<1x16x2xf32, #tpu.memory_space<vmem>>, vector<1x16x2xf32>,
    } else {
    }
    return
  }
  func.func @transform_0(%arg0: i32, %arg1: i32) -> (i32, i32, i32) {
    %c0_i32 = arith.constant 0 : i32
    %c0_i32_0 = arith.constant 0 : i32
    return %arg1, %c0_i32, %arg0 : i32, i32, i32
  }
  func.func @transform_1(%arg0: i32, %arg1: i32) -> (i32, i32) {
    %c0_i32 = arith.constant 0 : i32
    %c0_i32_0 = arith.constant 0 : i32
    %c0_i32_1 = arith.constant 0 : i32
    return %c0_i32, %c0_i32_0 : i32, i32
  }
  func.func @transform_2(%arg0: i32, %arg1: i32) -> (i32, i32) {
    %c0_i32 = arith.constant 0 : i32
    %c0_i32_0 = arith.constant 0 : i32
    %c0_i32_1 = arith.constant 0 : i32
    return %c0_i32, %c0_i32_0 : i32, i32
  }
  func.func @transform_3(%arg0: i32, %arg1: i32) -> (i32, i32, i32) {
    %c0_i32 = arith.constant 0 : i32
    %c0_i32_0 = arith.constant 0 : i32
    return %arg1, %c0_i32, %arg0 : i32, i32, i32
  }
  func.func @transform_4(%arg0: i32, %arg1: i32) -> (i32, i32, i32) {
    %c0_i32 = arith.constant 0 : i32
    %c0_i32_0 = arith.constant 0 : i32
    %c0_i32_1 = arith.constant 0 : i32
    return %arg0, %c0_i32, %c0_i32_0 : i32, i32, i32
  }
}

</mosaic_0001>

<bundles_post_ra>
// kernel: tpu_custom_call.1
= control target key start
LH: loop header
LB: loop body
LE: loop exit
PB: predicated region body
PF: predicated region fallthrough
CT: control target
= control target key end

     0   :  { %10 = vsyncpa [#allocation3], 0  ;;  %s908_s0 = inlined_call_operand.vmem [shape: f32[2,27,64], index: 0, kind: input, shape index: {}]   ;;  %s909_s1 = inlined_call_operand.vmem [shape: f32[13,27], index: 1, kind: input, shape index: {}]   ;;  %s910_s2 = inlined_call_operand.vmem [shape: f32[13,1], index: 2, kind: input, shape index: {}]   ;;  %s911_s3 = inlined_call_operand.hbm [shape: f32[2,16,64], index: 3, kind: output, shape index: {0}]   ;;  %s912_s4 = inlined_call_operand.vmem [shape: f32[1,16,2], index: 4, kind: output, shape index: {1}]  }
   0x1   :  { %12 = vsyncpa [#allocation3 + $0x1], 0  ;;  %s747_s15 = smov 0   ;;  %s749_s16 = smov 0  }
   0x2   :  { %s751_s17 = smov 0   ;;  %s753_s18 = smov 0  }
   0x3   :  { %s755_s19 = smov 0   ;;  %s757_s20 = smov 0  }
   0x4 LB: > { %s529_s21 = sadd.s32 4294967295, %s715_s20   ;;  %s530_s22 = sadd.s32 4294967294, %s715_s20   ;;  %s715_s20 = sphi %s757_s20, %s18_s20   ;;  %s711_s19 = sphi %s755_s19, %s919_s19   ;;  %s707_s18 = sphi %s753_s18, %s918_s18   ;;  %s703_s17 = sphi %s751_s17, %s917_s17   ;;  %s699_s16 = sphi %s749_s16, %s916_s16   ;;  %s695_s15 = sphi %s747_s15, %s915_s15  }
   0x5   : > { %s27_s23 = sadd.s32 1, %s711_s19  ;;  %s109_s24 = sadd.s32 1, %s703_s17 }
   0x6   : > { %p28_p0 = scmp.ge.s32.totalorder %s27_s23, 2  ;;  %p119_p1 = scmp.ne.s32.totalorder %s703_s17, %s699_s16 }
   0x7   : > { %p120_p2 = scmp.eq.s32.totalorder %s529_s21, 1  ;;  %p125_p3 = scmp.ne.s32.totalorder %s699_s16, %s695_s15 }
   0x8   : > { %s921_s23 = smov (%p28_p0, %s27_s23), 0  ;;  %p126_p5 = scmp.eq.s32.totalorder %s530_s22, 1 }
   0x9   : > { %p787_p4 = por %p120_p2, %p119_p1  ;;  %s104_s26 = ssub.s32 %s711_s19, %s921_s23 }
   0xa   : > { %p533_p6 = scmp.ge.s32.totalorder %s715_s20, 1  ;;  %p107_p7 = scmp.eq.s32.totalorder %s104_s26, 0 }
   0xb   : > { %p794_p8 = por %p126_p5, %p125_p3  ;;  %p187_p9 = scmp.lt.s32.totalorder %s715_s20, 3 }
   0xc   : > { %s800_s28 = scalar_select %p107_p7, %s703_s17, %s109_s24  }
   0xd   : > { %p188_p10 = pnand %p533_p6, %p187_p9 }
   0xe   : > { %p221_p11 = scmp.lt.s32.totalorder (!%p188_p10), %s707_s18, 1  ;;  %v238_v0 = vld [vmem:[%s909_s1] sm:$0xff] (!%p188_p10)  ;;  %vm252_vm0 = vcmask (!%p188_p10), 220160   ;;  %v241_v1 = vld [vmem:[%s910_s2 + $0x8] sm:$0x1f] (!%p188_p10)  ;;  %v717_v2 = vmov (!%p188_p10), 0  }
   0xf   : > { %191 = sbr.rel (%p188_p10) target bundleno = 440 (0x1b8), region = 32  ;;  %564 = vmatprep.mubr.msk.f32.mxu0 (!%p188_p10), %vm252_vm0, %v238_v0  ;;  %636 = vset.pattern.permute.xlu0 (!%p188_p10), %v717_v2  ;;  %v240_v3 = vld [vmem:[%s910_s2] sm:$0xff] (!%p188_p10)  ;;  %vm259_vm1 = vcmask (!%p188_p10), 1042432   ;;  %vm340_vm2 = vcmask (!%p188_p10), 1044480   ;;  %vm718_vm3 = vmmov (!%p188_p10), 1   ;;  %s211_s14 = sand.u32 (!%p188_p10), 1, %s699_s16  }
  0x10   : > { %249 = vperm.xlu0 (!%p188_p10), %636, %v241_v1   ;;  %vm572_vm4 = vmpackc.low (!%p188_p10), %vm259_vm1, %vm718_vm3  ;;  %s534_s21 = sshll.u32 (!%p188_p10), %s211_s14, 4  ;;  %vm357_vm5 = vcmask (!%p188_p10), 522244   ;;  %v239_v17 = vld [vmem:[%s909_s1 + $0x8] sm:$0x1f] (!%p188_p10)  ;;  %vm355_vm6 = vcmask (!%p188_p10), 520192   ;;  %vm353_vm7 = vcmask (!%p188_p10), 523264  }
  0x11   : > { %s824_s26 = scalar_lea.vmem (!%p188_p10), [#allocation2], %s534_s21  ;;  %vm380_vm8 = vcmask (!%p188_p10), 7168   ;;  %p540_p12 = scmp.ne.s32.totalorder (!%p188_p10), %s707_s18, 0 }
  0x14   : > { %244 = vperm.xlu0 (!%p188_p10), %636, %v240_v3  }
  0x16   : > { %s222_s7 = scalar_select %p221_p11, %s707_s18, 1 }
  0x17   : > { %vm392_vm9 = vcmask (!%p540_p12), 15360  }
  0x18   : > { %s548_s8 = sshll.u32 %s222_s7, 5 }
  0x19   : > { %s228_s13 = scalar_lea.vmem %s908_s0, %s548_s8 }
  0x1a   : > { %v234_v4 = vld [vmem:[%s228_s13] sm:$0xff]  ;;  %v235_v5 = vld [vmem:[%s228_s13 + $0x8] sm:$0xff]  ;;  %v236_v6 = vld [vmem:[%s228_s13 + $0x10] sm:$0xff] }
  0x1b   : > { %v567_v7 = vpack.c.bf16 %v235_v5, %v234_v4  ;;  %v341_v8 = vrot.slane %v235_v5, 3  ;;  %v342_v9 = vrot.slane %v236_v6, 3  ;;  %v237_v10 = vld [vmem:[%s228_s13 + $0x18] sm:$0x7] }
  0x1c   : > { %v571_v11 = vpack.c.bf16 %v237_v10, %v236_v6  ;;  %v346_v12 = vrot.slane %v237_v10, 3 }
  0x1d   : > { %568 = vmatprep.subr.bf16.mxu0 %v567_v7  ;;  %v343_v13 = vsel %vm340_vm2, %v341_v8, %v342_v9 }
  0x1e   : > { %v345_v14 = vmax.f32 %v235_v5, %v343_v13  ;;  %570 = vmatpush3.bf16.msra.mxu0 %v567_v7  ;;  %v348_v15 = vmax.f32 %v236_v6, %v346_v12 }
  0x1f   : > { %573 = vmatprep.subr.msk.bf16.mxu0 %vm572_vm4, %v571_v11 }
  0x20   : > { %v350_v16 = vrot.slane %v348_v15, 1 }
  0x22   : > { %576 = vmatpush3.bf16.msk.msra.mxu0 %vm572_vm4, %v571_v11  ;;  %v352_v18 = vmax.f32 %v345_v14, %v350_v16 }
  0x24   : > { %v373_v19 = vsel %vm357_vm5, %v352_v18, 0.0  ;;  %358 = vst.msk [vmem:[%s824_s26 + $0x9] sm:$0x70] %vm357_vm5, %v352_v18  ;;  %v376_v20 = vmul.f32 %v352_v18, %v352_v18 }
  0x25   : > { %565 = vmatmul.mubr.msk.f32.vlgmr.msra.gmra.mrb[0].mxu0 %vm252_vm0, %v239_v17  ;;  %374 = vadd.xlane.f32.xlu1 %v373_v19 }
  0x26   : > { %v377_v21 = vsel %vm357_vm5, %v376_v20, 0.0 }
  0x29   : > { %378 = vadd.xlane.f32.xlu1 %v377_v21 }
  0x8f   : > { %v250_v22 = vpop.permute.xlu0 %249 }
  0x93   : > { %v245_v24 = vpop.permute.xlu0 %244 }
  0xb2   : > { %v375_v34 = vpop.xlane.xlu1 %374 }
  0xb6   : > { %v379_v35 = vpop.xlane.xlu1 %378 }
  0xb7   : > { %v383_v37 = vsel %vm380_vm8, %v375_v34, %v379_v35 }
  0xb8   : > { %v385_v38 = vrot.slane %v383_v37, 7 }
  0xf8   : > { %v566_v23 = vpop.f32.mrb[0].mxu0 }
  0xf9   : > { %v335_v25 = vadd.f32 %v566_v23, %v250_v22  ;;  %v329_v26 = vpop.f32.mrb[1].mxu0 }
  0xfa   : > { %v330_v27 = vadd.f32 %v329_v26, %v245_v24 }
  0xfb   : > { %v362_v28 = vsel %vm355_vm6, %v335_v25, 0.0  ;;  %356 = vst.msk [vmem:[%s824_s26 + $0x8] sm:$0x1f] %vm355_vm6, %v335_v25  ;;  %v366_v30 = vmul.f32 %v335_v25, %v335_v25 }
  0xfc   : > { %363 = vadd.xlane.f32.xlu0 %v362_v28  ;;  %v359_v29 = vsel %vm353_vm7, %v330_v27, 0.0  ;;  %354 = vst.msk [vmem:[%s824_s26] sm:$0xff] %vm353_vm7, %v330_v27  ;;  %v365_v32 = vmul.f32 %v330_v27, %v330_v27 }
  0xfd   : > { %360 = vadd.xlane.f32.xlu1 %v359_v29  ;;  %v370_v31 = vsel %vm355_vm6, %v366_v30, 0.0 }
  0xfe   : > { %v367_v33 = vsel %vm353_vm7, %v365_v32, 0.0 }
 0x101   : > { %371 = vadd.xlane.f32.xlu1 %v370_v31 }
 0x105   : > { %368 = vadd.xlane.f32.xlu1 %v367_v33 }
 0x189   : > { %v364_v39 = vpop.xlane.xlu0 %363 }
 0x18a   : > { %v361_v36 = vpop.xlane.xlu1 %360 }
 0x18d   : > { %391 = sbr.rel (%p540_p12) target bundleno = 405 (0x195), region = 36 }
 0x18e   : > { %v372_v40 = vpop.xlane.xlu1 %371 }
 0x18f   : > { %v382_v41 = vsel %vm380_vm8, %v364_v39, %v372_v40 }
 0x190   : > { %v387_v42 = vsel %vm340_vm2, %v382_v41, %v385_v38 }
 0x191   : > { %394 = vst.msk [vmem:[%s912_s4 + $0x8] sm:$0xff] (!%p540_p12), %vm392_vm9, %v387_v42 }
 0x192   : > { %v369_v43 = vpop.xlane.xlu1 %368 }
 0x193   : > { %v381_v44 = vsel %vm380_vm8, %v361_v36, %v369_v43 }
 0x194   : > { %393 = vst.msk [vmem:[%s912_s4] sm:$0xff] %vm392_vm9, %v381_v44 }
 0x195 PF: > { %p541_p13 = scmp.eq.s32.totalorder %s707_s18, 0 }
 0x196   : > { %vm403_vm10 = vcmask (!%p541_p13), 15360  }
 0x197   : > { %398 = sbr.rel (%p541_p13) target bundleno = 415 (0x19f), region = 40 }
 0x199   : > { %v400_v46 = vld [vmem:[%s912_s4 + $0x8] sm:$0xff] (!%p541_p13) }
 0x19a   : > { %v402_v48 = vadd.f32 (!%p541_p13), %v400_v46, %v387_v42 }
 0x19b   : > { %v399_v45 = vld [vmem:[%s912_s4] sm:$0xff] (!%p541_p13) }
 0x19c   : > { %v401_v47 = vadd.f32 (!%p541_p13), %v399_v45, %v381_v44  ;;  %405 = vst.msk [vmem:[%s912_s4 + $0x8] sm:$0xff] (!%p541_p13), %vm403_vm10, %v402_v48 }
 0x19e   : > { %404 = vst.msk [vmem:[%s912_s4] sm:$0xff] %vm403_vm10, %v401_v47 }
 0x19f PF: > { %s549_s22 = sshll.u32 %s707_s18, 8  ;;  %s426_s5 = sshll.u32 %s824_s26, 4  ;;  %s858_s5 = int_to_ptr.vmem [resolvable:$true] %s426_s5 }
 0x1a0   : > { %s855_s30 = scalar_lea.hbm %s911_s3, %s549_s22  ;;  %s862_s6 = scalar_lea.sflag [#allocation3], %s211_s14 }
 0x1a1   : > { %s637_s7 = scalar_lea.vmem %s858_s5, 256  ;;  %s719_s18 = smov [#allocation2]  }
 0x1a2   : > { %p638_p0 = scmp.ne.s32.totalorder %s858_s5, %s637_s7  ;;  %s641_s8 = sshll.u32 %s719_s18, 4  ;;  %s642_s8 = int_to_ptr.vmem [resolvable:$false] %s641_s8 }
 0x1a3   : > { %s643_s9 = scalar_lea.vmem %s642_s8, 512  ;;  %p644_p3 = scmp.lt.s32.totalorder %s858_s5, %s642_s8 }
 0x1a4   : > { %p639_p1 = pnand %p638_p0, %p787_p4  ;;  %p645_p5 = scmp.lt.s32.totalorder %s643_s9, %s637_s7 }
 0x1a6   : > { %p640_p2 = pneg %p639_p1  ;;  %p646_p6 = por %p645_p5, %p644_p3 }
 0x1a8   : > { %p647_p7 = pnand %p646_p6, %p640_p2 }
 0x1aa   : > { %650 = shalt.err (!%p647_p7)
}
 0x1ab   : > { %s651_s14 = scalar_lea.hbm %s855_s30, 256  ;;  %s655_s11 = scalar_lea.hbm %s911_s3, 512 }
 0x1ac   : > { %p652_p9 = scmp.ne.s32.totalorder %s855_s30, %s651_s14  ;;  %p656_p12 = scmp.lt.u32.totalorder %s855_s30, %s911_s3 }
 0x1ad   : > { %p657_p13 = scmp.lt.u32.totalorder %s655_s11, %s651_s14  ;;  %p659_p1 = scmp.lt.u32.totalorder %s651_s14, %s855_s30 }
 0x1ae   : > { %p653_p10 = pnand %p652_p9, %p787_p4 }
 0x1af   : > { %p658_p0 = por %p657_p13, %p656_p12 }
 0x1b0   : > { %p654_p11 = pneg %p653_p10 }
 0x1b1   : > { %p660_p2 = por %p659_p1, %p658_p0 }
 0x1b3   : > { %p661_p3 = pnand %p660_p2, %p654_p11 }
 0x1b5   : > { %664 = shalt.err (!%p661_p3)
}
 0x1b6   : > { %s720_s21 = smov 128   ;;  %s721_s22 = smov 8  }
 0x1b7   : > { %577 = dma.vmem_to_hbm [thread:$0]  (%p787_p4), %s858_s5, 256, %s855_s30, %s862_s6, %s720_s21, %s720_s21, %s721_s22  }
 0x1b8 PF: > { %p583_p5 = scmp.ge.s32.totalorder %s715_s20, 2  ;;  %s452_s24 = sand.u32 1, %s695_s15  }
 0x1b9   : > { %s453_s29 = scalar_lea.sflag [#allocation3], %s452_s24 }
 0x1ba   : > { %p580_p6 = pnand %p583_p5, %p794_p8 }
 0x1bc   : > { %690 = dma.done.wait (!%p580_p6), %s453_s29, 256  }
 0x1bd   : > { %692 = vsyncadd (!%p580_p6), %s453_s29, 4294967040  ;;  %s18_s20 = sadd.s32 1, %s715_s20   ;;  %s915_s15 = smov %s699_s16 }
 0x1be   : > { %p15_p7 = scmp.ge.s32.totalorder %s18_s20, 4   ;;  %s916_s16 = smov %s703_s17 }
 0x1bf   : > { %s917_s17 = smov %s800_s28  ;;  %s918_s18 = smov %s711_s19 }
 0x1c0   : > { %s919_s19 = smov %s921_s23  ;;  %17 = sbr.rel (!%p15_p7) target bundleno = 4 (0x4), region = 87 }
 0x1c7   :  { %458 = vsyncpa [#allocation3], 1 }
 0x1c8   :  { %460 = vsyncpa [#allocation3 + $0x1], 1 }

</bundles_post_ra>
